<compile_context>
chip_gen: v7x
topology: tpu7x:2x2x1
jax: 0.10.0
libtpu: 0.0.40
codegen_flags: <defaults>
</compile_context>

<pallas_src>
import functools

import jax
import jax.numpy as jnp
from jax.experimental import pallas as pl
from jax.experimental.pallas import tpu as pltpu


def _graph_loss_kernel(a_ref, bext_ref, w_ref, out_ref, *, precision=None):
    a = a_ref[...]        # (tm, D)     source tile, native dtype
    bext = bext_ref[...]  # (N, D+2)    [B | ||b||^2 | 1], resident
    w = w_ref[...]        # (tm, N)     W tile, native dtype

    d = a.shape[1]

    # Single MXU pass per tile: columns [0:D] -> W@B, [D] -> W@||b||^2,
    # [D+1] -> rowsum(W).  f32 accumulation.
    r = jnp.dot(w, bext, preferred_element_type=jnp.float32, precision=precision)

    a32 = a.astype(jnp.float32)
    sa = jnp.sum(a32 * a32, axis=1, keepdims=True)            # (tm, 1)
    cross = jnp.sum(a32 * r[:, :d], axis=1, keepdims=True)    # (tm, 1)

    # Zero-padded rows (a = 0, W row = 0) contribute exactly 0.
    per_row = r[:, d:d + 1] + sa * r[:, d + 1:d + 2] - 2.0 * cross

    total = jnp.sum(per_row)                                  # per-tile scalar
    out_ref[...] = jnp.broadcast_to(total, out_ref.shape).astype(jnp.float32)


def _round_up(x, m):
    return (x + m - 1) // m * m


def _sublane_multiple(*dtypes):
    # packed sublane count: 8 for 4-byte, 16 for 2-byte, 32 for 1-byte dtypes
    return max(max(8, 32 // jnp.dtype(dt).itemsize) for dt in dtypes)


def second_stage_graph_loss(source_data, target_data, W, class_num=None, *,
                            tm=1024, mxu_in_bf16=False, precision=None):
    """Pallas implementation of second_stage_graph_loss.forward."""
    del class_num  # unused by the reference forward pass
    M, D = source_data.shape
    N, Db = target_data.shape
    assert D == Db and W.shape == (M, N)

    in_dtype = jnp.result_type(source_data.dtype, target_data.dtype, W.dtype)
    if not jnp.issubdtype(in_dtype, jnp.floating):
        in_dtype = jnp.float32
    mxu_dtype = jnp.bfloat16 if mxu_in_bf16 else in_dtype

    source_data = source_data.astype(in_dtype)

    # ||b_j||^2 computed once in f32; fold [B | sb | 1] into one MXU operand.
    tgt32 = target_data.astype(jnp.float32)
    sb = jnp.sum(tgt32 * tgt32, axis=1, keepdims=True)
    b_ext = jnp.concatenate([tgt32, sb, jnp.ones_like(sb)], axis=1).astype(mxu_dtype)
    W = W.astype(mxu_dtype)

    sub = _sublane_multiple(in_dtype, mxu_dtype)
    m_sub = _round_up(M, sub)

    # Row tile: as large as the VMEM budget allows, but keep >=2 grid steps when
    # M permits so ("parallel",) can shard across v7x's two TensorCores.
    tm = max(sub, min(int(tm), m_sub))
    if m_sub >= 2 * sub:
        tm = min(tm, _round_up(pl.cdiv(m_sub, 2), sub))

    # Generation-aware VMEM budget (v7x: 64 MiB/TC; v5e/v6e: 128 MiB).
    try:
        vmem_cap = int(pltpu.get_tpu_info().vmem_capacity_bytes)
    except Exception:
        vmem_cap = 64 << 20  # conservative fallback
    budget = int(vmem_cap * 0.75)

    in_isz = jnp.dtype(in_dtype).itemsize
    mxu_isz = jnp.dtype(mxu_dtype).itemsize

    def vmem_est(tm_):
        return (2 * tm_ * D * in_isz          # double-buffered source tiles
                + 2 * tm_ * N * mxu_isz       # double-buffered W tiles
                + 1 * N * (D + 2) * mxu_isz   # resident B_ext (single-buffered)
                + 2 * 128 * 4)                # per-tile scalar output blocks

    while tm > sub and vmem_est(tm) > budget:
        tm = _round_up(max(tm // 2, sub), sub)
    # TODO(synk): if vmem_est(sub) still exceeds the budget (huge N on v7x),
    #             tile N with an inner "arbitrary" grid axis instead of
    #             shrinking tm further.

    m_pad = _round_up(M, tm)
    if m_pad != M:
        pad = m_pad - M
        source_data = jnp.pad(source_data, ((0, pad), (0, 0)))
        W = jnp.pad(W, ((0, pad), (0, 0)))  # zero rows -> zero contribution
    grid = (m_pad // tm,)

    vmem_limit = int(min(max(vmem_est(tm) * 1.25 + (2 << 20), 16 << 20),
                         int(vmem_cap * 0.85)))

    partials = pl.pallas_call(
        functools.partial(_graph_loss_kernel, precision=precision),
        out_shape=jax.ShapeDtypeStruct((grid[0], 1, 128), jnp.float32),
        grid_spec=pltpu.PrefetchScalarGridSpec(
            num_scalar_prefetch=0,
            grid=grid,
            in_specs=[
                pl.BlockSpec((tm, D), lambda i: (i, 0)),       # source tile
                pl.BlockSpec((N, D + 2), lambda i: (0, 0),     # resident B_ext,
                             pipeline_mode=pl.Buffered(1)),    # single-buffered
                pl.BlockSpec((tm, N), lambda i: (i, 0)),       # W tile
            ],
            out_specs=pl.BlockSpec((1, 1, 128), lambda i: (i, 0, 0)),
        ),
        compiler_params=pltpu.CompilerParams(
            dimension_semantics=("parallel",),                 # independent M tiles
            vmem_limit_bytes=vmem_limit,
        ),
    )(source_data, b_ext, W)

    return jnp.sum(partials[:, 0, 0])


def _reference(source_data, target_data, W):
    src = source_data.astype(jnp.float32)
    tgt = target_data.astype(jnp.float32)
    w = W.astype(jnp.float32)
    prod = src @ tgt.T
    sa = jnp.sum(src ** 2, axis=1, keepdims=True)
    sb = jnp.sum(tgt ** 2, axis=1, keepdims=True).T
    return jnp.sum((sa + sb - 2.0 * prod) * w)


if __name__ == "__main__":
    key = jax.random.PRNGKey(0)
    k1, k2, k3, k4, k5, k6 = jax.random.split(key, 6)
    class_num = 4  # unused by the forward pass, kept for signature parity

    # Case 1: aligned shapes, multi-step grid.
    M, N, D = 512, 128, 32
    src = jax.random.normal(k1, (M, D), dtype=jnp.float32)
    tgt = jax.random.normal(k2, (N, D), dtype=jnp.float32)
    W = jax.random.uniform(k3, (M, N), dtype=jnp.float32)
    loss = jax.block_until_ready(second_stage_graph_loss(src, tgt, W, class_num))
    ref = _reference(src, tgt, W)
    assert jnp.allclose(loss, ref, rtol=1e-3, atol=1e-2), (loss, ref)

    # Case 2: ragged, non-aligned shapes exercising the zero-padding path.
    M2, N2, D2 = 50, 96, 40
    src2 = jax.random.normal(k4, (M2, D2), dtype=jnp.float32)
    tgt2 = jax.random.normal(k5, (N2, D2), dtype=jnp.float32)
    W2 = jax.random.uniform(k6, (M2, N2), dtype=jnp.float32)
    loss2 = jax.block_until_ready(second_stage_graph_loss(src2, tgt2, W2, class_num))
    ref2 = _reference(src2, tgt2, W2)
    assert jnp.allclose(loss2, ref2, rtol=1e-3, atol=1e-2), (loss2, ref2)

    # Case 3: bf16 MXU-operand streaming path (halved W/B HBM traffic).
    loss3 = jax.block_until_ready(
        second_stage_graph_loss(src, tgt, W, class_num, mxu_in_bf16=True))
    assert jnp.allclose(loss3, ref, rtol=5e-3, atol=1e-1), (loss3, ref)

    print("KERNEL_OK")
</pallas_src>

<mosaic_0001>
module attributes {stable_mosaic.version = 11 : i64} {
  func.func @_graph_loss_kernel(%arg0: i32, %arg1: memref<256x32xf32, #tpu.memory_space<vmem>>, %arg2: memref<128x34xf32, #tpu.memory_space<vmem>>, %arg3: memref<256x128xf32, #tpu.memory_space<vmem>>, %arg4: memref<1x1x128xf32, #tpu.memory_space<vmem>>) attributes {dimension_semantics = [#tpu.dimension_semantics<parallel>], iteration_bounds = array<i64: 2>, scalar_prefetch = 0 : i64, scratch_operands = 0 : i64, tpu.core_type = #tpu.core_type<tc>, window_params = [{transform_indices = @transform_0, window_bounds = array<i64: 256, 32>}, {pipeline_mode = #tpu.pipeline_mode<synchronous>, transform_indices = @transform_1, window_bounds = array<i64: 128, 34>}, {transform_indices = @transform_2, window_bounds = array<i64: 256, 128>}, {transform_indices = @transform_3, window_bounds = array<i64: 1, 1, 128>}]} {
    %c0 = arith.constant 0 : index
    %c0_0 = arith.constant 0 : index
    %0 = vector.load %arg1[%c0, %c0_0] : memref<256x32xf32, #tpu.memory_space<vmem>>, vector<256x32xf32>
    %c0_1 = arith.constant 0 : index
    %c0_2 = arith.constant 0 : index
    %1 = vector.load %arg2[%c0_1, %c0_2] : memref<128x34xf32, #tpu.memory_space<vmem>>, vector<128x34xf32>
    %c0_3 = arith.constant 0 : index
    %c0_4 = arith.constant 0 : index
    %2 = vector.load %arg3[%c0_3, %c0_4] : memref<256x128xf32, #tpu.memory_space<vmem>>, vector<256x128xf32>
    %cst = arith.constant dense<0.000000e+00> : vector<256x34xf32>
    %3 = tpu.matmul %2, %1, %cst {dimension_numbers = #tpu.dot_dimension_numbers<[1], [0], [0], [1], [0, 0, 1, 1], [], []>} : vector<256x128xf32>, vector<128x34xf32>, vector<256x34xf32> -> vector<256x34xf32>
    %4 = arith.mulf %0, %0 : vector<256x32xf32>
    %cst_5 = arith.constant dense<0.000000e+00> : vector<256xf32>
    %5 = vector.multi_reduction <add>, %4, %cst_5 [1] : vector<256x32xf32> to vector<256xf32>
    %6 = vector.shape_cast %5 : vector<256xf32> to vector<256x1xf32>
    %7 = vector.extract_strided_slice %3 {offsets = [0, 0], sizes = [256, 32], strides = [1, 1]} : vector<256x34xf32> to vector<256x32xf32>
    %8 = arith.mulf %0, %7 : vector<256x32xf32>
    %cst_6 = arith.constant dense<0.000000e+00> : vector<256xf32>
    %9 = vector.multi_reduction <add>, %8, %cst_6 [1] : vector<256x32xf32> to vector<256xf32>
    %10 = vector.shape_cast %9 : vector<256xf32> to vector<256x1xf32>
    %11 = vector.extract_strided_slice %3 {offsets = [0, 32], sizes = [256, 1], strides = [1, 1]} : vector<256x34xf32> to vector<256x1xf32>
    %12 = vector.extract_strided_slice %3 {offsets = [0, 33], sizes = [256, 1], strides = [1, 1]} : vector<256x34xf32> to vector<256x1xf32>
    %13 = arith.mulf %6, %12 : vector<256x1xf32>
    %14 = arith.addf %11, %13 : vector<256x1xf32>
    %cst_7 = arith.constant 2.000000e+00 : f32
    %15 = vector.broadcast %cst_7 : f32 to vector<256x1xf32>
    %16 = arith.mulf %15, %10 : vector<256x1xf32>
    %17 = arith.subf %14, %16 : vector<256x1xf32>
    %18 = vector.shape_cast %17 : vector<256x1xf32> to vector<1x256x1xf32>
    %cst_8 = arith.constant dense<0.000000e+00> : vector<1xf32>
    %19 = vector.multi_reduction <add>, %18, %cst_8 [1, 2] : vector<1x256x1xf32> to vector<1xf32>
    %20 = vector.shape_cast %19 : vector<1xf32> to vector<1x1x1xf32>
    %21 = vector.extract %20[0, 0, 0] : f32 from vector<1x1x1xf32>
    %22 = vector.broadcast %21 : f32 to vector<1x1x128xf32>
    %c0_9 = arith.constant 0 : index
    %c0_10 = arith.constant 0 : index
    %c0_11 = arith.constant 0 : index
    %23 = vector.load %arg4[%c0_9, %c0_10, %c0_11] : memref<1x1x128xf32, #tpu.memory_space<vmem>>, vector<1x1x128xf32>
    tpu.vector_store %arg4[%c0_9, %c0_10, %c0_11], %22 {strides = array<i32>} : memref<1x1x128xf32, #tpu.memory_space<vmem>>, vector<1x1x128xf32>,
    return
  }
  func.func @transform_0(%arg0: i32) -> (i32, i32) {
    %c0_i32 = arith.constant 0 : i32
    %c0_i32_0 = arith.constant 0 : i32
    return %arg0, %c0_i32 : i32, i32
  }
  func.func @transform_1(%arg0: i32) -> (i32, i32) {
    %c0_i32 = arith.constant 0 : i32
    %c0_i32_0 = arith.constant 0 : i32
    %c0_i32_1 = arith.constant 0 : i32
    return %c0_i32, %c0_i32_0 : i32, i32
  }
  func.func @transform_2(%arg0: i32) -> (i32, i32) {
    %c0_i32 = arith.constant 0 : i32
    %c0_i32_0 = arith.constant 0 : i32
    return %arg0, %c0_i32 : i32, i32
  }
  func.func @transform_3(%arg0: i32) -> (i32, i32, i32) {
    %c0_i32 = arith.constant 0 : i32
    %c0_i32_0 = arith.constant 0 : i32
    %c0_i32_1 = arith.constant 0 : i32
    return %arg0, %c0_i32, %c0_i32_0 : i32, i32, i32
  }
}

</mosaic_0001>

<bundles_post_ra>
// kernel: tpu_custom_call.1
= control target key start
LH: loop header
LB: loop body
LE: loop exit
PB: predicated region body
PF: predicated region fallthrough
CT: control target
= control target key end

     0   :  { %8 = vsyncpa [#allocation3], 0  ;;  %s2524_s0 = inlined_call_operand.vmem [shape: f32[512,32], index: 0, kind: input, shape index: {}]   ;;  %s2525_s1 = inlined_call_operand.vmem [shape: f32[128,34], index: 1, kind: input, shape index: {}]   ;;  %s2526_s2 = inlined_call_operand.vmem [shape: f32[512,128], index: 2, kind: input, shape index: {}]   ;;  %s2527_s3 = inlined_call_operand.hbm [shape: f32[2,1,128], index: 3, kind: output, shape index: {}]  }
   0x1   :  { %10 = vsyncpa [#allocation3 + $0x1], 0  ;;  %s1610_s12 = smov 0   ;;  %s1612_s13 = smov 0  }
   0x2   :  { %s1614_s14 = smov 0   ;;  %s1616_s15 = smov 0  }
   0x3 LB: > { %s1631_s16 = sadd.s32 4294967295, %s1585_s15   ;;  %s1293_s17 = sadd.s32 4294967294, %s1585_s15   ;;  %s1585_s15 = sphi %s1616_s15, %s2617_s15   ;;  %s1581_s14 = sphi %s1614_s14, %s2616_s14   ;;  %s1577_s13 = sphi %s1612_s13, %s2615_s13   ;;  %s1573_s12 = sphi %s1610_s12, %s2614_s12  }
   0x4   : > { %s1635_s18 = sadd.s32 1, %s1585_s15   ;;  %s96_s19 = sadd.s32 1, %s1581_s14 }
   0x5   : > { %s93_s20 = ssub.s32 %s1585_s15, %s1635_s18  ;;  %p106_p0 = scmp.ne.s32.totalorder %s1581_s14, %s1577_s13 }
   0x6   : > { %p94_p1 = scmp.eq.s32.totalorder %s93_s20, 0  ;;  %p107_p2 = scmp.eq.s32.totalorder %s1631_s16, 1 }
   0x7   : > { %p112_p3 = scmp.ne.s32.totalorder %s1577_s13, %s1573_s12  ;;  %p113_p4 = scmp.eq.s32.totalorder %s1293_s17, 1 }
   0x8   : > { %s1646_s21 = scalar_select %p94_p1, %s1581_s14, %s96_s19  }
   0x9   : > { %p1648_p5 = por %p107_p2, %p106_p0  ;;  %p1652_p6 = por %p113_p4, %p112_p3 }
   0xa   : > { %p1296_p7 = scmp.ge.s32.totalorder %s1585_s15, 1  ;;  %p152_p8 = scmp.lt.s32.totalorder %s1585_s15, 3 }
   0xc   : > { %p153_p9 = pnand %p1296_p7, %p152_p8 }
   0xe   : > { %156 = sbr.rel (%p153_p9) target bundleno = 1140 (0x474), region = 32 }
  0x15   : > { %v224_v0 = vld [vmem:[%s2525_s1] sm:$0xff]  ;;  %v225_v1 = vld [vmem:[%s2525_s1 + $0x8] sm:$0xff]  ;;  %v226_v2 = vld [vmem:[%s2525_s1 + $0x10] sm:$0xff]  ;;  %s1297_s30 = sshll.u32 %s1631_s16, 5  ;;  %vm529_vm0 = vcmask 261120   ;;  %s1588_s29 = smov 96  }
  0x16   : > { %v1432_v3 = vpack.c.bf16 %v225_v1, %v224_v0  ;;  %v227_v4 = vld [vmem:[%s2525_s1 + $0x18] sm:$0xff]  ;;  %p181_p10 = scmp.lt.s32.totalorder %s1297_s30, 63  ;;  %v228_v6 = vld [vmem:[%s2525_s1 + $0x20] sm:$0xff]  ;;  %v229_v7 = vld [vmem:[%s2525_s1 + $0x28] sm:$0xff]  ;;  %vm1138_vm1 = vcmask 7168  }
  0x17   : > { %v1436_v5 = vpack.c.bf16 %v227_v4, %v226_v2  ;;  %v1440_v8 = vpack.c.bf16 %v229_v7, %v228_v6  ;;  %v230_v9 = vld [vmem:[%s2525_s1 + $0x30] sm:$0xff]  ;;  %v231_v10 = vld [vmem:[%s2525_s1 + $0x38] sm:$0xff]  ;;  %v232_v14 = vld [vmem:[%s2525_s1 + $0x40] sm:$0xff] }
  0x18   : > { %1433 = vmatprep.subr.bf16.mxu0 %v1432_v3  ;;  %1464 = vmatprep.subr.bf16.mxu1 %v1432_v3  ;;  %s2619_s30 = smov (!%p181_p10, %s1297_s30), 63  ;;  %v1444_v13 = vpack.c.bf16 %v231_v10, %v230_v9  ;;  %v233_v15 = vld [vmem:[%s2525_s1 + $0x48] sm:$0xff]  ;;  %v234_v20 = vld [vmem:[%s2525_s1 + $0x50] sm:$0xff]  ;;  %v235_v21 = vld [vmem:[%s2525_s1 + $0x58] sm:$0xff] }
  0x19   : > { %1435 = vmatpush3.bf16.msra.mxu0 %v1432_v3  ;;  %1472 = vmatpush3.bf16.msra.mxu1 %v1432_v3  ;;  %s1298_s10 = sshll.u32 %s2619_s30, 3  ;;  %v1448_v16 = vpack.c.bf16 %v233_v15, %v232_v14  ;;  %v1452_v31 = vpack.c.bf16 %v235_v21, %v234_v20  ;;  %v236_v32 = vld [vmem:[%s2525_s1 + $0x60] sm:$0xff]  ;;  %v237_v33 = vld [vmem:[%s2525_s1 + $0x68] sm:$0xff]  ;;  %v238_v41 = vld [vmem:[%s2525_s1 + $0x70] sm:$0xff]  ;;  %s178_s30 = sand.u32 1, %s1577_s13  }
  0x1a   : > { %1437 = vmatprep.subr.bf16.mxu0 %v1436_v5  ;;  %1465 = vmatprep.subr.bf16.mxu1 %v1436_v5  ;;  %s1686_s26 = scalar_lea.vmem %s2526_s2, %s1298_s10  ;;  %s1699_s6 = scalar_lea.vmem %s2524_s0, %s1298_s10  ;;  %v1456_v40 = vpack.c.bf16 %v237_v33, %v236_v32  ;;  %v239_v42 = vld [vmem:[%s2525_s1 + $0x78] sm:$0xff] }
  0x1b   : > { %v240_v11 = vld [vmem:[%s1686_s26] sm:$0xff]  ;;  %v1702_v17 = vld [vmem:[%s1699_s6 + $0x10] sm:$0xff]  ;;  %v1708_v19 = vld [vmem:[%s1699_s6 + $0x18] sm:$0xff]  ;;  %v1460_v49 = vpack.c.bf16 %v239_v42, %v238_v41  ;;  %s179_s4 = scalar_lea.vmem [#allocation2], %s178_s30  ;;  %s1214_s11 = scalar_lea.sflag [#allocation3], %s178_s30 }
  0x1c   : > { %v256_v12 = vld [vmem:[%s1686_s26 + $0x80] sm:$0xff]  ;;  %1384 = vmatprep.mubr.f32.mxu0 %v240_v11  ;;  %v499_v22 = vmul.f32 %v1702_v17, %v1702_v17  ;;  %v1721_v24 = vld [vmem:[%s1699_s6 + $0x8] sm:$0xff]  ;;  %v500_v25 = vmul.f32 %v1708_v19, %v1708_v19  ;;  %v1748_v38 = vld [vmem:[%s1699_s6 + $0x38] sm:$0xff]  ;;  %s1226_s5 = sshll.u32 %s179_s4, 4  ;;  %s2479_s5 = int_to_ptr.vmem [resolvable:$true] %s1226_s5 }
  0x1d   : > { %1439 = vmatpush3.bf16.msra.mxu0 %v1436_v5  ;;  %1473 = vmatpush3.bf16.msra.mxu1 %v1436_v5  ;;  %v1705_v18 = vld [vmem:[%s1699_s6] sm:$0xff]  ;;  %v498_v26 = vmul.f32 %v1721_v24, %v1721_v24  ;;  %v1730_v29 = vld [vmem:[%s1699_s6 + $0x28] sm:$0xff]  ;;  %2545 = vst [vmem:[#allocation5_spill] sm:$0xff] %v1748_v38  ;;  %v1751_v39 = vld [vmem:[%s1699_s6 + $0x30] sm:$0xff]  ;;  %v504_v45 = vmul.f32 %v1748_v38, %v1748_v38  ;;  %s1523_s17 = scalar_lea.vmem %s2479_s5, 16 }
  0x1e   : > { %1441 = vmatprep.subr.bf16.mxu0 %v1440_v8  ;;  %1466 = vmatprep.subr.bf16.mxu1 %v1440_v8  ;;  %v497_v23 = vmul.f32 %v1705_v18, %v1705_v18  ;;  %v536_v27 = vsel %vm529_vm0, %v499_v22, 0.0  ;;  %v1733_v30 = vld [vmem:[%s1699_s6 + $0x20] sm:$0xff]  ;;  %v539_v34 = vsel %vm529_vm0, %v500_v25, 0.0  ;;  %v502_v36 = vmul.f32 %v1730_v29, %v1730_v29  ;;  %v1766_v47 = vld [vmem:[%s1699_s6 + $0x48] sm:$0xff]  ;;  %v1778_v54 = vld [vmem:[%s1699_s6 + $0x58] sm:$0xff]  ;;  %p1524_p11 = scmp.ne.s32.totalorder %s2479_s5, %s1523_s17 }
  0x1f   : > { %1408 = vmatprep.mubr.f32.mxu1 %v256_v12  ;;  %537 = vadd.xlane.f32.xlu1 %v536_v27  ;;  %v533_v35 = vsel %vm529_vm0, %v498_v26, 0.0  ;;  %v501_v37 = vmul.f32 %v1733_v30, %v1733_v30  ;;  %v503_v46 = vmul.f32 %v1751_v39, %v1751_v39  ;;  %2546 = vst [vmem:[#allocation6_spill] sm:$0xff] %v1766_v47  ;;  %v1769_v48 = vld [vmem:[%s1699_s6 + $0x40] sm:$0xff]  ;;  %v551_v50 = vsel %vm529_vm0, %v504_v45, 0.0  ;;  %v1781_v55 = vld [vmem:[%s1699_s6 + $0x50] sm:$0xff]  ;;  %v241_v56 = vld [vmem:[%s1686_s26 + $0x8] sm:$0xff] }
  0x20   : > { %v530_v28 = vsel %vm529_vm0, %v497_v23, 0.0  ;;  %v545_v43 = vsel %vm529_vm0, %v502_v36, 0.0  ;;  %v506_v52 = vmul.f32 %v1766_v47, %v1766_v47  ;;  %v505_v53 = vmul.f32 %v1769_v48, %v1769_v48  ;;  %v257_v61 = vld [vmem:[%s1686_s26 + $0x88] sm:$0xff]  ;;  %v1795_v63 = vld [vmem:[%s1699_s6 + $0x60] sm:$0xff]  ;;  %v242_v0 = vld [vmem:[%s1686_s26 + $0x10] sm:$0xff]  ;;  %p1525_p12 = pnand %p1524_p11, %p1648_p5 }
  0x21   : > { %1443 = vmatpush3.bf16.msra.mxu0 %v1440_v8  ;;  %1474 = vmatpush3.bf16.msra.mxu1 %v1440_v8  ;;  %v542_v44 = vsel %vm529_vm0, %v501_v37, 0.0  ;;  %v548_v51 = vsel %vm529_vm0, %v503_v46, 0.0  ;;  %v508_v59 = vmul.f32 %v1778_v54, %v1778_v54  ;;  %v507_v60 = vmul.f32 %v1781_v55, %v1781_v55  ;;  %v1792_v62 = vld [vmem:[%s1699_s6 + $0x68] sm:$0xff]  ;;  %2547 = vst [vmem:[#allocation7_spill] sm:$0xff] %v1795_v63  ;;  %v258_v1 = vld [vmem:[%s1686_s26 + $0x90] sm:$0xff]  ;;  %v243_v2 = vld [vmem:[%s1686_s26 + $0x18] sm:$0xff] }
  0x22   : > { %1445 = vmatprep.subr.bf16.mxu0 %v1444_v13  ;;  %1467 = vmatprep.subr.bf16.mxu1 %v1444_v13  ;;  %v557_v57 = vsel %vm529_vm0, %v506_v52, 0.0  ;;  %v554_v58 = vsel %vm529_vm0, %v505_v53, 0.0  ;;  %v510_v5 = vmul.f32 %v1792_v62, %v1792_v62  ;;  %v509_v6 = vmul.f32 %v1795_v63, %v1795_v63  ;;  %v259_v7 = vld [vmem:[%s1686_s26 + $0x98] sm:$0xff]  ;;  %v1811_v9 = vld [vmem:[%s1699_s6 + $0x70] sm:$0xff]  ;;  %v244_v10 = vld [vmem:[%s1686_s26 + $0x20] sm:$0xff]  ;;  %p1526_p13 = pneg %p1525_p12 }
  0x23   : > { %531 = vadd.xlane.f32.xlu0 %v530_v28  ;;  %540 = vadd.xlane.f32.xlu1 %v539_v34  ;;  %v563_v3 = vsel %vm529_vm0, %v508_v59, 0.0  ;;  %v560_v4 = vsel %vm529_vm0, %v507_v60, 0.0  ;;  %v1808_v8 = vld [vmem:[%s1699_s6 + $0x78] sm:$0xff]  ;;  %2549 = vst [vmem:[#allocation9_spill] sm:$0xff] %v1811_v9  ;;  %v260_v11 = vld [vmem:[%s1686_s26 + $0xa0] sm:$0xff]  ;;  %v245_v12 = vld [vmem:[%s1686_s26 + $0x28] sm:$0xff] }
  0x24   : > { %2548 = vst [vmem:[#allocation8_spill] sm:$0xff] %v1808_v8  ;;  %v566_v14 = vsel %vm529_vm0, %v509_v6, 0.0  ;;  %v512_v15 = vmul.f32 %v1808_v8, %v1808_v8  ;;  %v1823_v20 = vld [vmem:[%s1699_s6 + $0x88] sm:$0xff]  ;;  %v1826_v21 = vld [vmem:[%s1699_s6 + $0x80] sm:$0xff]  ;;  %v246_v23 = vld [vmem:[%s1686_s26 + $0x30] sm:$0xff] }
  0x25   : > { %1447 = vmatpush3.bf16.msra.mxu0 %v1444_v13  ;;  %1475 = vmatpush3.bf16.msra.mxu1 %v1444_v13  ;;  %v569_v13 = vsel %vm529_vm0, %v510_v5, 0.0  ;;  %v261_v22 = vld [vmem:[%s1686_s26 + $0xa8] sm:$0xff]  ;;  %v262_v25 = vld [vmem:[%s1686_s26 + $0xb0] sm:$0xff]  ;;  %v247_v26 = vld [vmem:[%s1686_s26 + $0x38] sm:$0xff]  ;;  %v513_v32 = vmul.f32 %v1826_v21, %v1826_v21 }
  0x26   : > { %1449 = vmatprep.subr.bf16.mxu0 %v1448_v16  ;;  %1468 = vmatprep.subr.bf16.mxu1 %v1448_v16  ;;  %v575_v27 = vsel %vm529_vm0, %v512_v15, 0.0  ;;  %v263_v33 = vld [vmem:[%s1686_s26 + $0xb8] sm:$0xff]  ;;  %v248_v36 = vld [vmem:[%s1686_s26 + $0x40] sm:$0xff]  ;;  %v265_v45 = vld [vmem:[%s1686_s26 + $0xc8] sm:$0xff] }
  0x27   : > { %534 = vadd.xlane.f32.xlu0 %v533_v35  ;;  %546 = vadd.xlane.f32.xlu1 %v545_v43  ;;  %v1840_v34 = vld [vmem:[%s1699_s6 + $0x98] sm:$0xff]  ;;  %v1843_v35 = vld [vmem:[%s1699_s6 + $0x90] sm:$0xff]  ;;  %v264_v37 = vld [vmem:[%s1686_s26 + $0xc0] sm:$0xff]  ;;  %v578_v42 = vsel %vm529_vm0, %v513_v32, 0.0 }
  0x28   : > { %v516_v43 = vmul.f32 %v1840_v34, %v1840_v34  ;;  %v1856_v46 = vld [vmem:[%s1699_s6 + $0xa8] sm:$0xff]  ;;  %v251_v52 = vld [vmem:[%s1686_s26 + $0x58] sm:$0xff] }
  0x29   : > { %1451 = vmatpush3.bf16.msra.mxu0 %v1448_v16  ;;  %1476 = vmatpush3.bf16.msra.mxu1 %v1448_v16  ;;  %v511_v16 = vmul.f32 %v1811_v9, %v1811_v9  ;;  %v267_v59 = vld [vmem:[%s1686_s26 + $0xd8] sm:$0xff] }
  0x2a   : > { %1453 = vmatprep.subr.bf16.mxu0 %v1452_v31  ;;  %1469 = vmatprep.subr.bf16.mxu1 %v1452_v31  ;;  %v587_v53 = vsel %vm529_vm0, %v516_v43, 0.0  ;;  %v1872_v60 = vld [vmem:[%s1699_s6 + $0xb8] sm:$0xff] }
  0x2b   : > { %543 = vadd.xlane.f32.xlu0 %v542_v44  ;;  %552 = vadd.xlane.f32.xlu1 %v551_v50  ;;  %v572_v28 = vsel %vm529_vm0, %v511_v16, 0.0  ;;  %v515_v44 = vmul.f32 %v1843_v35, %v1843_v35  ;;  %v250_v50 = vld [vmem:[%s1686_s26 + $0x50] sm:$0xff]  ;;  %v520_v5 = vmul.f32 %v1872_v60, %v1872_v60 }
  0x2d   : > { %1455 = vmatpush3.bf16.msra.mxu0 %v1452_v31  ;;  %1477 = vmatpush3.bf16.msra.mxu1 %v1452_v31  ;;  %v514_v31 = vmul.f32 %v1823_v20, %v1823_v20  ;;  %v599_v15 = vsel %vm529_vm0, %v520_v5, 0.0 }
  0x2e   : > { %1457 = vmatprep.subr.bf16.mxu0 %v1456_v40  ;;  %1470 = vmatprep.subr.bf16.mxu1 %v1456_v40 }
  0x2f   : > { %549 = vadd.xlane.f32.xlu0 %v548_v51  ;;  %558 = vadd.xlane.f32.xlu1 %v557_v57  ;;  %v581_v41 = vsel %vm529_vm0, %v514_v31, 0.0  ;;  %v266_v51 = vld [vmem:[%s1686_s26 + $0xd0] sm:$0xff]  ;;  %v518_v57 = vmul.f32 %v1856_v46, %v1856_v46 }
  0x31   : > { %1459 = vmatpush3.bf16.msra.mxu0 %v1456_v40  ;;  %1478 = vmatpush3.bf16.msra.mxu1 %v1456_v40  ;;  %v249_v40 = vld [vmem:[%s1686_s26 + $0x48] sm:$0xff] }
  0x32   : > { %1461 = vmatprep.subr.bf16.mxu0 %v1460_v49  ;;  %1471 = vmatprep.subr.bf16.mxu1 %v1460_v49 }
  0x33   : > { %555 = vadd.xlane.f32.xlu0 %v554_v58  ;;  %564 = vadd.xlane.f32.xlu1 %v563_v3  ;;  %v593_v3 = vsel %vm529_vm0, %v518_v57, 0.0 }
  0x35   : > { %1463 = vmatpush3.bf16.msra.mxu0 %v1460_v49  ;;  %1479 = vmatpush3.bf16.msra.mxu1 %v1460_v49  ;;  %v1859_v49 = vld [vmem:[%s1699_s6 + $0xa0] sm:$0xff] }
  0x36   : > { %v517_v58 = vmul.f32 %v1859_v49, %v1859_v49 }
  0x37   : > { %561 = vadd.xlane.f32.xlu0 %v560_v4  ;;  %570 = vadd.xlane.f32.xlu1 %v569_v13  ;;  %v270_v13 = vld [vmem:[%s1686_s26 + $0xf0] sm:$0xff] }
  0x38   : > { %1385 = vmatmul.mubr.f32.vlgmr.msra.gmra.mrb[0].mxu0 %v241_v56  ;;  %1409 = vmatmul.mubr.f32.vlgmr.msra.gmra.mrb[0].mxu1 %v257_v61  ;;  %v584_v56 = vsel %vm529_vm0, %v515_v44, 0.0  ;;  %v1875_v61 = vld [vmem:[%s1699_s6 + $0xb0] sm:$0xff]  ;;  %v590_v4 = vsel %vm529_vm0, %v517_v58, 0.0  ;;  %v1928_v44 = vld [vmem:[%s1699_s6 + $0xf8] sm:$0xff] }
  0x39   : > { %1387 = vmatprep.mubr.f32.mxu0 %v242_v0  ;;  %1411 = vmatprep.mubr.f32.mxu1 %v258_v1  ;;  %v252_v0 = vld [vmem:[%s1686_s26 + $0x60] sm:$0xff]  ;;  %v519_v6 = vmul.f32 %v1875_v61, %v1875_v61  ;;  %2551 = vst [vmem:[#allocation11_spill] sm:$0xff] %v1928_v44 }
  0x3a   : > { %v268_v1 = vld [vmem:[%s1686_s26 + $0xe0] sm:$0xff] }
  0x3b   : > { %567 = vadd.xlane.f32.xlu0 %v566_v14  ;;  %576 = vadd.xlane.f32.xlu1 %v575_v27  ;;  %v255_v14 = vld [vmem:[%s1686_s26 + $0x78] sm:$0xff]  ;;  %v596_v16 = vsel %vm529_vm0, %v519_v6, 0.0  ;;  %v1907_v27 = vld [vmem:[%s1699_s6 + $0xd0] sm:$0xff] }
  0x3c   : > { %1388 = vmatmul.mubr.f32.gmra.mrb[2].mxu0 %v243_v2  ;;  %1412 = vmatmul.mubr.f32.gmra.mrb[2].mxu1 %v259_v7  ;;  %v253_v2 = vld [vmem:[%s1686_s26 + $0x68] sm:$0xff] }
  0x3d   : > { %1390 = vmatprep.mubr.f32.mxu0 %v244_v10  ;;  %1414 = vmatprep.mubr.f32.mxu1 %v260_v11  ;;  %v269_v7 = vld [vmem:[%s1686_s26 + $0xe8] sm:$0xff]  ;;  %v1891_v11 = vld [vmem:[%s1699_s6 + $0xc0] sm:$0xff] }
  0x3e   : > { %v1888_v10 = vld [vmem:[%s1699_s6 + $0xc8] sm:$0xff] }
  0x3f   : > { %573 = vadd.xlane.f32.xlu0 %v572_v28  ;;  %582 = vadd.xlane.f32.xlu1 %v581_v41 }
  0x40   : > { %1391 = vmatmul.mubr.f32.gmra.mrb[4].mxu0 %v245_v12  ;;  %1415 = vmatmul.mubr.f32.gmra.mrb[4].mxu1 %v261_v22  ;;  %v254_v12 = vld [vmem:[%s1686_s26 + $0x70] sm:$0xff]  ;;  %v522_v22 = vmul.f32 %v1888_v10, %v1888_v10 }
  0x41   : > { %1393 = vmatprep.mubr.f32.mxu0 %v246_v23  ;;  %1417 = vmatprep.mubr.f32.mxu1 %v262_v25  ;;  %v521_v23 = vmul.f32 %v1891_v11, %v1891_v11  ;;  %v271_v25 = vld [vmem:[%s1686_s26 + $0xf8] sm:$0xff]  ;;  %s1587_s26 = smov 127  }
  0x42   : > { %v605_v28 = vsel %vm529_vm0, %v522_v22, 0.0 }
  0x43   : > { %579 = vadd.xlane.f32.xlu0 %v578_v42  ;;  %588 = vadd.xlane.f32.xlu1 %v587_v53  ;;  %v602_v31 = vsel %vm529_vm0, %v521_v23, 0.0 }
  0x44   : > { %1394 = vmatmul.mubr.f32.gmra.mrb[6].mxu0 %v247_v26  ;;  %1418 = vmatmul.mubr.f32.gmra.mrb[6].mxu1 %v263_v33  ;;  %v1904_v26 = vld [vmem:[%s1699_s6 + $0xd8] sm:$0xff]  ;;  %v523_v33 = vmul.f32 %v1907_v27, %v1907_v27 }
  0x45   : > { %1396 = vmatprep.mubr.f32.mxu0 %v248_v36  ;;  %1420 = vmatprep.mubr.f32.mxu1 %v264_v37  ;;  %v524_v32 = vmul.f32 %v1904_v26, %v1904_v26  ;;  %v1916_v36 = vld [vmem:[%s1699_s6 + $0xe8] sm:$0xff]  ;;  %v1919_v37 = vld [vmem:[%s1699_s6 + $0xe0] sm:$0xff] }
  0x46   : > { %2550 = vst [vmem:[#allocation10_spill] sm:$0xff] %v1919_v37  ;;  %v608_v41 = vsel %vm529_vm0, %v523_v33, 0.0  ;;  %v526_v42 = vmul.f32 %v1916_v36, %v1916_v36  ;;  %v525_v43 = vmul.f32 %v1919_v37, %v1919_v37 }
  0x47   : > { %585 = vadd.xlane.f32.xlu0 %v584_v56  ;;  %594 = vadd.xlane.f32.xlu1 %v593_v3 }
  0x48   : > { %1397 = vmatmul.mubr.f32.gmra.mrb[8].mxu0 %v249_v40  ;;  %1421 = vmatmul.mubr.f32.gmra.mrb[8].mxu1 %v265_v45  ;;  %v611_v40 = vsel %vm529_vm0, %v524_v32, 0.0  ;;  %v1931_v45 = vld [vmem:[%s1699_s6 + $0xf0] sm:$0xff]  ;;  %s1301_s6 = sshll.u32 %s1631_s16, 4  ;;  %s1589_s16 = smov [#allocation2]  }
  0x49   : > { %1399 = vmatprep.mubr.f32.mxu0 %v250_v50  ;;  %1423 = vmatprep.mubr.f32.mxu1 %v266_v51  ;;  %2552 = vst [vmem:[#allocation12_spill] sm:$0xff] %v1931_v45  ;;  %v617_v50 = vsel %vm529_vm0, %v526_v42, 0.0  ;;  %v614_v51 = vsel %vm529_vm0, %v525_v43, 0.0  ;;  %v527_v53 = vmul.f32 %v1931_v45, %v1931_v45  ;;  %s2484_s10 = scalar_lea.hbm %s2527_s3, %s1301_s6  ;;  %s1527_s19 = sshll.u32 %s1589_s16, 4  ;;  %s1528_s19 = int_to_ptr.vmem [resolvable:$false] %s1527_s19 }
  0x4a   : > { %s1529_s20 = scalar_lea.vmem %s1528_s19, 32  ;;  %p1530_p0 = scmp.lt.s32.totalorder %s2479_s5, %s1528_s19 }
  0x4b   : > { %591 = vadd.xlane.f32.xlu0 %v590_v4  ;;  %600 = vadd.xlane.f32.xlu1 %v599_v15  ;;  %v620_v57 = vsel %vm529_vm0, %v527_v53, 0.0  ;;  %p1531_p1 = scmp.lt.s32.totalorder %s1529_s20, %s1523_s17 }
  0x4c   : > { %1400 = vmatmul.mubr.f32.gmra.mrb[10].mxu0 %v251_v52  ;;  %1424 = vmatmul.mubr.f32.gmra.mrb[10].mxu1 %v267_v59  ;;  %v528_v52 = vmul.f32 %v1928_v44, %v1928_v44 }
  0x4d   : > { %1402 = vmatprep.mubr.f32.mxu0 %v252_v0  ;;  %1426 = vmatprep.mubr.f32.mxu1 %v268_v1  ;;  %p1532_p2 = por %p1531_p1, %p1530_p0 }
  0x4e   : > { %v623_v56 = vsel %vm529_vm0, %v528_v52, 0.0 }
  0x4f   : > { %597 = vadd.xlane.f32.xlu0 %v596_v16  ;;  %606 = vadd.xlane.f32.xlu1 %v605_v28  ;;  %p1533_p3 = pnand %p1532_p2, %p1526_p13 }
  0x50   : > { %1403 = vmatmul.mubr.f32.gmra.mrb[12].mxu0 %v253_v2  ;;  %1427 = vmatmul.mubr.f32.gmra.mrb[12].mxu1 %v269_v7 }
  0x51   : > { %1405 = vmatprep.mubr.f32.mxu0 %v254_v12  ;;  %1429 = vmatprep.mubr.f32.mxu1 %v270_v13 }
  0x53   : > { %603 = vadd.xlane.f32.xlu0 %v602_v31  ;;  %612 = vadd.xlane.f32.xlu1 %v611_v40 }
  0x54   : > { %1406 = vmatmul.mubr.f32.gmra.mrb[14].mxu0 %v255_v14  ;;  %1430 = vmatmul.mubr.f32.gmra.mrb[14].mxu1 %v271_v25 }
  0x57   : > { %609 = vadd.xlane.f32.xlu0 %v608_v41  ;;  %618 = vadd.xlane.f32.xlu1 %v617_v50 }
  0x5b   : > { %615 = vadd.xlane.f32.xlu0 %v614_v51  ;;  %624 = vadd.xlane.f32.xlu1 %v623_v56 }
  0x5f   : > { %621 = vadd.xlane.f32.xlu0 %v620_v57 }
  0xac   : > { %v1941_v58 = vpop.xlane.xlu1 %537 }
  0xb0   : > { %v1943_v59 = vpop.xlane.xlu1 %540  ;;  %v532_v6 = vpop.xlane.xlu0 %531 }
  0xb4   : > { %v1945_v0 = vpop.xlane.xlu1 %546  ;;  %v535_v12 = vpop.xlane.xlu0 %534 }
  0xb8   : > { %v1947_v1 = vpop.xlane.xlu1 %552  ;;  %v1993_v53 = vpop.xlane.xlu0 %543 }
  0xbc   : > { %v1949_v2 = vpop.xlane.xlu1 %558 }
  0xbd   : > { %2553 = vst [vmem:[#allocation13_spill] sm:$0xff] %v1949_v2 }
  0xc0   : > { %v1951_v3 = vpop.xlane.xlu1 %564 }
  0xc1   : > { %2554 = vst [vmem:[#allocation14_spill] sm:$0xff] %v1951_v3 }
  0xc4   : > { %v1953_v4 = vpop.xlane.xlu1 %570 }
  0xc5   : > { %2555 = vst [vmem:[#allocation15_spill] sm:$0xff] %v1953_v4  ;;  %v2011_v4 = vpop.xlane.xlu0 %549 }
  0xc6   : > { %2558 = vst [vmem:[#allocation18_spill] sm:$0xff] %v2011_v4 }
  0xc8   : > { %v1955_v5 = vpop.xlane.xlu1 %576 }
  0xc9   : > { %2556 = vst [vmem:[#allocation16_spill] sm:$0xff] %v1955_v5  ;;  %v2029_v37 = vpop.xlane.xlu0 %555 }
  0xca   : > { %2563 = vst [vmem:[#allocation23_spill] sm:$0xff] %v2029_v37 }
  0xcc   : > { %v583_v7 = vpop.xlane.xlu1 %582 }
 0x10b   : > { %v1957_v13 = vpop.f32.mrb[0].mxu0  ;;  %v1959_v14 = vpop.f32.mrb[0].mxu1 }
 0x10c   : > { %v755_v15 = vmul.f32 %v1957_v13, %v535_v12  ;;  %v771_v16 = vmul.f32 %v1959_v14, %v583_v7  ;;  %v1963_v22 = vpop.f32.mrb[1].mxu1  ;;  %v1965_v23 = vpop.f32.mrb[1].mxu0  ;;  %v643_v9 = vmul.f32 %v1959_v14, %v1823_v20  ;;  %v627_v38 = vmul.f32 %v1957_v13, %v1721_v24 }
 0x10d   : > { %v626_v4 = vmul.f32 %v1965_v23, %v1705_v18  ;;  %v642_v20 = vmul.f32 %v1963_v22, %v1826_v21 }
 0x10e   : > { %852 = vrot.lane.b32.xlu1 %v771_v16, %s1587_s26  ;;  %820 = vrot.lane.b32.xlu0 %v755_v15, %s1587_s26 }
 0x10f   : > { %v1969_v25 = vpop.f32.mrb[2].mxu0  ;;  %v1971_v28 = vpop.f32.mrb[2].mxu1  ;;  %v706_v37 = vsel %vm529_vm0, %v642_v20, 0.0 }
 0x110   : > { %v1973_v31 = vpop.f32.mrb[3].mxu0  ;;  %v1975_v32 = vpop.f32.mrb[3].mxu1  ;;  %v757_v21 = vmul.f32 %v1969_v25, %v1943_v59 }
 0x113   : > { %v1977_v33 = vpop.f32.mrb[4].mxu0  ;;  %v1979_v40 = vpop.f32.mrb[4].mxu1 }
 0x114   : > { %v1981_v41 = vpop.f32.mrb[5].mxu0  ;;  %v1983_v42 = vpop.f32.mrb[5].mxu1 }
 0x117   : > { %v1985_v43 = vpop.f32.mrb[6].mxu0  ;;  %v1987_v50 = vpop.f32.mrb[6].mxu1 }
 0x118   : > { %v1989_v51 = vpop.f32.mrb[7].mxu0  ;;  %v1991_v52 = vpop.f32.mrb[7].mxu1 }
 0x11b   : > { %v1995_v56 = vpop.f32.mrb[8].mxu0  ;;  %v1997_v57 = vpop.f32.mrb[8].mxu1 }
 0x11c   : > { %2557 = vst [vmem:[#allocation17_spill] sm:$0xff] %v1995_v56  ;;  %v1999_v7 = vpop.f32.mrb[9].mxu0  ;;  %v2001_v12 = vpop.f32.mrb[9].mxu1 }
 0x11f   : > { %v2003_v15 = vpop.f32.mrb[10].mxu0  ;;  %v2005_v16 = vpop.f32.mrb[10].mxu1 }
 0x120   : > { %v2007_v5 = vpop.f32.mrb[11].mxu0  ;;  %v2009_v63 = vpop.f32.mrb[11].mxu1 }
 0x123   : > { %v2013_v3 = vpop.f32.mrb[12].mxu0  ;;  %v2015_v47 = vpop.f32.mrb[12].mxu1 }
 0x124   : > { %v2017_v56 = vpop.f32.mrb[13].mxu0  ;;  %v2019_v2 = vpop.f32.mrb[13].mxu1 }
 0x125   : > { %2559 = vst [vmem:[#allocation19_spill] sm:$0xff] %v2017_v56  ;;  %2560 = vst [vmem:[#allocation20_spill] sm:$0xff] %v2019_v2  ;;  %v709_v56 = vsel %vm529_vm0, %v643_v9, 0.0  ;;  %v2038_v2 = vpop.xlane.xlu0 %561  ;;  %v754_v9 = vmul.f32 %v532_v6, %v1965_v23 }
 0x127   : > { %v2021_v45 = vpop.f32.mrb[14].mxu0  ;;  %v2023_v44 = vpop.f32.mrb[14].mxu1 }
 0x128   : > { %2561 = vst [vmem:[#allocation21_spill] sm:$0xff] %v2021_v45  ;;  %2562 = vst [vmem:[#allocation22_spill] sm:$0xff] %v2023_v44  ;;  %v2027_v8 = vpop.f32.mrb[15].mxu0  ;;  %v658_v45 = vsel %vm529_vm0, %v626_v4, 0.0  ;;  %v661_v44 = vsel %vm529_vm0, %v627_v38, 0.0  ;;  %v589_v4 = vpop.xlane.xlu1 %588 }
 0x129   : > { %v2043_v18 = vpop.xlane.xlu0 %567 }
 0x12a   : > { %2564 = vst [vmem:[#allocation24_spill] sm:$0xff] %v2043_v18  ;;  %v2083_v18 = vpop.f32.mrb[15].mxu1 }
 0x12b   : > { %2571 = vst [vmem:[#allocation31_spill] sm:$0xff] %v2083_v18 }
 0x12d   : > { %710 = vadd.xlane.f32.xlu0 %v709_v56  ;;  %v2045_v24 = vpop.xlane.xlu0 %573 }
 0x12e   : > { %2565 = vst [vmem:[#allocation25_spill] sm:$0xff] %v2045_v24 }
 0x131   : > { %659 = vadd.xlane.f32.xlu0 %v658_v45  ;;  %v580_v56 = vpop.xlane.xlu0 %579 }
 0x132   : > { %662 = vadd.xlane.f32.xlu1 %v661_v44  ;;  %v770_v38 = vmul.f32 %v580_v56, %v1963_v22  ;;  %v773_v44 = vmul.f32 %v1971_v28, %v589_v4 }
 0x135   : > { %707 = vadd.xlane.f32.xlu0 %v706_v37  ;;  %v756_v37 = vmul.f32 %v1941_v58, %v1973_v31  ;;  %v586_v45 = vpop.xlane.xlu0 %585  ;;  %v645_v58 = vmul.f32 %v1971_v28, %v1840_v34 }
 0x137   : > { %v715_v4 = vsel %vm529_vm0, %v645_v58, 0.0 }
 0x139   : > { %v592_v6 = vpop.xlane.xlu0 %591 }
 0x13d   : > { %v2059_v20 = vpop.xlane.xlu0 %597 }
 0x141   : > { %v2061_v56 = vpop.xlane.xlu0 %603 }
 0x142   : > { %2566 = vst [vmem:[#allocation26_spill] sm:$0xff] %v2061_v56  ;;  %v644_v56 = vmul.f32 %v1975_v32, %v1843_v35 }
 0x143   : > { %818 = vrot.lane.b32.xlu1 %v754_v9, %s1587_s26  ;;  %v595_v9 = vpop.xlane.xlu1 %594 }
 0x145   : > { %v2065_v59 = vpop.xlane.xlu0 %609 }
 0x146   : > { %2568 = vst [vmem:[#allocation28_spill] sm:$0xff] %v2065_v59  ;;  %v629_v59 = vmul.f32 %v1969_v25, %v1708_v19 }
 0x147   : > { %850 = vrot.lane.b32.xlu1 %v770_v38, %s1587_s26  ;;  %v2063_v38 = vpop.xlane.xlu1 %600 }
 0x148   : > { %2567 = vst [vmem:[#allocation27_spill] sm:$0xff] %v2063_v38 }
 0x14b   : > { %822 = vrot.lane.b32.xlu0 %v756_v37, %s1587_s26  ;;  %824 = vrot.lane.b32.xlu1 %v757_v21, %s1587_s26  ;;  %v2069_v37 = vpop.xlane.xlu1 %606  ;;  %v628_v21 = vmul.f32 %v1973_v31, %v1702_v17  ;;  %v712_v17 = vsel %vm529_vm0, %v644_v56, 0.0  ;;  %v759_v56 = vmul.f32 %v1977_v33, %v1945_v0 }
 0x14d   : > { %v664_v24 = vsel %vm529_vm0, %v628_v21, 0.0 }
 0x14f   : > { %856 = vrot.lane.b32.xlu1 %v773_v44, %s1587_s26  ;;  %v2074_v44 = vpop.xlane.xlu0 %615  ;;  %v2081_v34 = vpop.xlane.xlu1 %612 }
 0x150   : > { %2569 = vst [vmem:[#allocation29_spill] sm:$0xff] %v2074_v44  ;;  %2570 = vst [vmem:[#allocation30_spill] sm:$0xff] %v2081_v34 }
 0x153   : > { %v622_v38 = vpop.xlane.xlu0 %621  ;;  %v2090_v21 = vpop.xlane.xlu1 %618 }
 0x154   : > { %v2086_v58 = vmul.f32 %v622_v38, %v2083_v18  ;;  %v772_v38 = vmul.f32 %v586_v45, %v1975_v32  ;;  %v647_v45 = vmul.f32 %v1979_v40, %v1856_v46 }
 0x156   : > { %v721_v0 = vsel %vm529_vm0, %v647_v45, 0.0 }
 0x157   : > { %v2092_v35 = vpop.xlane.xlu1 %624 }
 0x16a   : > { %716 = vadd.xlane.f32.xlu0 %v715_v4  ;;  %v667_v4 = vsel %vm529_vm0, %v629_v59, 0.0  ;;  %v775_v59 = vmul.f32 %v1979_v40, %v595_v9  ;;  %v630_v9 = vmul.f32 %v1981_v41, %v1733_v30 }
 0x16e   : > { %665 = vadd.xlane.f32.xlu0 %v664_v24 }
 0x172   : > { %713 = vadd.xlane.f32.xlu0 %v712_v17 }
 0x173   : > { %668 = vadd.xlane.f32.xlu1 %v667_v4  ;;  %v670_v4 = vsel %vm529_vm0, %v630_v9, 0.0 }
 0x180   : > { %v853_v24 = vpop.permute.xlu1 %852  ;;  %v821_v19 = vpop.permute.xlu0 %820 }
 0x181   : > { %v2095_v44 = vadd.f32 %v1959_v14, %v853_v24  ;;  %v2098_v34 = vadd.f32 %v1957_v13, %v821_v19  ;;  %v758_v14 = vmul.f32 %v1993_v53, %v1981_v41  ;;  %v631_v13 = vmul.f32 %v1977_v33, %v1730_v29 }
 0x182   : > { %v646_v53 = vmul.f32 %v1983_v42, %v1859_v49  ;;  %v649_v29 = vmul.f32 %v1987_v50, %v1872_v60  ;;  %v632_v19 = vmul.f32 %v1989_v51, %v1751_v39  ;;  %v774_v49 = vmul.f32 %v592_v6, %v1983_v42 }
 0x183   : > { %v673_v17 = vsel %vm529_vm0, %v631_v13, 0.0  ;;  %v761_v13 = vmul.f32 %v1985_v43, %v1947_v1 }
 0x184   : > { %854 = vrot.lane.b32.xlu1 %v772_v38, %s1587_s26  ;;  %v718_v46 = vsel %vm529_vm0, %v646_v53, 0.0  ;;  %v727_v24 = vsel %vm529_vm0, %v649_v29, 0.0  ;;  %v676_v30 = vsel %vm529_vm0, %v632_v19, 0.0  ;;  %v648_v38 = vmul.f32 %v1991_v52, %v1875_v61 }
 0x185   : > { %v637_v19 = vmul.f32 %v2003_v15, %v1778_v54 }
 0x186   : > { %v724_v60 = vsel %vm529_vm0, %v648_v38, 0.0 }
 0x188   : > { %828 = vrot.lane.b32.xlu0 %v759_v56, %s1587_s26  ;;  %860 = vrot.lane.b32.xlu1 %v775_v59, %s1587_s26 }
 0x18c   : > { %826 = vrot.lane.b32.xlu0 %v758_v14, %s1587_s26  ;;  %v651_v14 = vmul.f32 %v1997_v57, %v1888_v10 }
 0x1ab   : > { %722 = vadd.xlane.f32.xlu0 %v721_v0  ;;  %v634_v0 = vmul.f32 %v1999_v7, %v1769_v48 }
 0x1ac   : > { %674 = vadd.xlane.f32.xlu1 %v673_v17  ;;  %v733_v17 = vsel %vm529_vm0, %v651_v14, 0.0  ;;  %v636_v14 = vmul.f32 %v2007_v5, %v1781_v55 }
 0x1ad   : > { %v682_v1 = vsel %vm529_vm0, %v634_v0, 0.0  ;;  %v2572_v0 = vld [vmem:[#allocation5_spill] sm:$0xff] }
 0x1af   : > { %671 = vadd.xlane.f32.xlu0 %v670_v4  ;;  %v650_v4 = vmul.f32 %v2001_v12, %v1891_v11 }
 0x1b3   : > { %719 = vadd.xlane.f32.xlu0 %v718_v46 }
 0x1b7   : > { %728 = vadd.xlane.f32.xlu0 %v727_v24  ;;  %v730_v24 = vsel %vm529_vm0, %v650_v4, 0.0  ;;  %v2573_v4 = vld [vmem:[#allocation10_spill] sm:$0xff] }
 0x1ba   : > { %v711_v56 = vpop.xlane.xlu0 %710 }
 0x1bb   : > { %v2131_v59 = vmul.f32 2.0, %v711_v56  ;;  %677 = vadd.xlane.f32.xlu0 %v676_v30  ;;  %v691_v56 = vsel %vm529_vm0, %v637_v19, 0.0  ;;  %v2576_v19 = vld [vmem:[#allocation21_spill] sm:$0xff]  ;;  %v2594_v30 = vld [vmem:[#allocation16_spill] sm:$0xff] }
 0x1bd   : > { %858 = vrot.lane.b32.xlu1 %v774_v49, %s1587_s26  ;;  %v653_v49 = vmul.f32 %v2005_v16, %v1904_v26  ;;  %v639_v26 = vmul.f32 %v2013_v3, %v1792_v62 }
 0x1be   : > { %v2141_v61 = vpop.xlane.xlu0 %659 }
 0x1bf   : > { %v663_v45 = vpop.xlane.xlu1 %662  ;;  %725 = vadd.xlane.f32.xlu0 %v724_v60  ;;  %v739_v54 = vsel %vm529_vm0, %v653_v49, 0.0 }
 0x1c0   : > { %v2143_v6 = vmul.f32 2.0, %v663_v45 }
 0x1c1   : > { %832 = vrot.lane.b32.xlu1 %v761_v13, %s1587_s26  ;;  %v688_v13 = vsel %vm529_vm0, %v636_v14, 0.0  ;;  %v2579_v14 = vld [vmem:[#allocation22_spill] sm:$0xff] }
 0x1c2   : > { %v708_v53 = vpop.xlane.xlu0 %707 }
 0x1c3   : > { %v2151_v9 = vpop.permute.xlu1 %818  ;;  %734 = vadd.xlane.f32.xlu0 %v733_v17  ;;  %v2156_v46 = vmul.f32 2.0, %v708_v53  ;;  %v655_v17 = vmul.f32 %v2015_v47, %v1916_v36  ;;  %v2577_v36 = vld [vmem:[#allocation9_spill] sm:$0xff] }
 0x1c5   : > { %v745_v55 = vsel %vm529_vm0, %v655_v17, 0.0  ;;  %v2581_v17 = vld [vmem:[#allocation18_spill] sm:$0xff] }
 0x1c7   : > { %683 = vadd.xlane.f32.xlu0 %v682_v1  ;;  %v851_v29 = vpop.permute.xlu1 %850  ;;  %v633_v1 = vmul.f32 %v1985_v43, %v2572_v0 }
 0x1c8   : > { %v2159_v48 = vadd.f32 %v851_v29, %v1963_v22 }
 0x1c9   : > { %v679_v29 = vsel %vm529_vm0, %v633_v1, 0.0 }
 0x1cb   : > { %731 = vadd.xlane.f32.xlu0 %v730_v24  ;;  %v825_v38 = vpop.permute.xlu1 %824  ;;  %v2575_v24 = vld [vmem:[#allocation8_spill] sm:$0xff] }
 0x1cc   : > { %v2167_v11 = vadd.f32 %v1969_v25, %v825_v38  ;;  %v652_v25 = vmul.f32 %v2009_v63, %v1907_v27  ;;  %v2574_v27 = vld [vmem:[#allocation20_spill] sm:$0xff]  ;;  %v641_v38 = vmul.f32 %v2576_v19, %v2575_v24  ;;  %v2582_v24 = vld [vmem:[#allocation13_spill] sm:$0xff] }
 0x1cd   : > { %v654_v53 = vmul.f32 %v2574_v27, %v2573_v4  ;;  %v776_v4 = vmul.f32 %v2059_v20, %v1991_v52 }
 0x1ce   : > { %v736_v45 = vsel %vm529_vm0, %v652_v25, 0.0  ;;  %v703_v49 = vsel %vm529_vm0, %v641_v38, 0.0  ;;  %v2580_v25 = vld [vmem:[#allocation12_spill] sm:$0xff]  ;;  %v2583_v38 = vld [vmem:[#allocation17_spill] sm:$0xff] }
 0x1cf   : > { %692 = vadd.xlane.f32.xlu0 %v691_v56  ;;  %v857_v22 = vpop.permute.xlu1 %856  ;;  %v742_v62 = vsel %vm529_vm0, %v654_v53, 0.0  ;;  %v640_v56 = vmul.f32 %v2027_v8, %v2577_v36  ;;  %v763_v36 = vmul.f32 %v2583_v38, %v2582_v24 }
 0x1d0   : > { %v2173_v60 = vadd.f32 %v1971_v28, %v857_v22  ;;  %v697_v28 = vsel %vm529_vm0, %v639_v26, 0.0 }
 0x1d1   : > { %v700_v22 = vsel %vm529_vm0, %v640_v56, 0.0 }
 0x1d3   : > { %740 = vadd.xlane.f32.xlu0 %v739_v54  ;;  %v2578_v54 = vld [vmem:[#allocation11_spill] sm:$0xff] }
 0x1d7   : > { %689 = vadd.xlane.f32.xlu0 %v688_v13  ;;  %v657_v13 = vmul.f32 %v2579_v14, %v2578_v54 }
 0x1d9   : > { %v751_v26 = vsel %vm529_vm0, %v657_v13, 0.0 }
 0x1db   : > { %737 = vadd.xlane.f32.xlu0 %v736_v45  ;;  %v656_v45 = vmul.f32 %v2083_v18, %v2580_v25  ;;  %v2595_v18 = vld [vmem:[#allocation25_spill] sm:$0xff] }
 0x1dd   : > { %v748_v0 = vsel %vm529_vm0, %v656_v45, 0.0 }
 0x1df   : > { %698 = vadd.xlane.f32.xlu0 %v697_v28  ;;  %v823_v28 = vpop.permute.xlu0 %822 }
 0x1e3   : > { %746 = vadd.xlane.f32.xlu0 %v745_v55  ;;  %v760_v55 = vmul.f32 %v2581_v17, %v1989_v51 }
 0x1e5   : > { %680 = vadd.xlane.f32.xlu1 %v679_v29  ;;  %v769_v29 = vmul.f32 %v2576_v19, %v2594_v30 }
 0x1e7   : > { %743 = vadd.xlane.f32.xlu0 %v742_v62 }
 0x1eb   : > { %704 = vadd.xlane.f32.xlu0 %v703_v49 }
 0x1ef   : > { %701 = vadd.xlane.f32.xlu0 %v700_v22 }
 0x1f3   : > { %752 = vadd.xlane.f32.xlu0 %v751_v26 }
 0x1f6   : > { %830 = vrot.lane.b32.xlu1 %v760_v55, %s1587_s26 }
 0x1f7   : > { %749 = vadd.xlane.f32.xlu0 %v748_v0  ;;  %v717_v1 = vpop.xlane.xlu0 %716 }
 0x1f8   : > { %v2211_v53 = vmul.f32 2.0, %v717_v1  ;;  %v779_v1 = vmul.f32 %v1997_v57, %v2069_v37 }
 0x1fa   : > { %862 = vrot.lane.b32.xlu1 %v776_v4, %s1587_s26  ;;  %v946_v4 = vmul.f32 2.0, %v2141_v61 }
 0x1fb   : > { %v666_v62 = vpop.xlane.xlu0 %665 }
 0x1fe   : > { %836 = vrot.lane.b32.xlu1 %v763_v36, %s1587_s26  ;;  %v916_v36 = vadd.f32 %v823_v28, %v1973_v31 }
 0x1ff   : > { %v714_v56 = vpop.xlane.xlu0 %713 }
 0x200   : > { %v669_v49 = vpop.xlane.xlu1 %668  ;;  %v2226_v45 = vmul.f32 2.0, %v714_v56 }
 0x201   : > { %v2219_v22 = vmul.f32 2.0, %v669_v49 }
 0x203   : > { %v829_v54 = vpop.permute.xlu0 %828 }
 0x204   : > { %v2224_v13 = vadd.f32 %v1977_v33, %v829_v54  ;;  %v855_v25 = vpop.permute.xlu1 %854  ;;  %v914_v33 = vadd.f32 %v2151_v9, %v1965_v23  ;;  %v2585_v23 = vld [vmem:[#allocation23_spill] sm:$0xff]  ;;  %v764_v54 = vmul.f32 %v2038_v2, %v2007_v5 }
 0x205   : > { %v2229_v26 = vadd.f32 %v855_v25, %v1975_v32  ;;  %v948_v32 = vmul.f32 2.0, %v666_v62  ;;  %v762_v61 = vmul.f32 %v2585_v23, %v1999_v7  ;;  %v2586_v62 = vld [vmem:[#allocation14_spill] sm:$0xff]  ;;  %v2589_v23 = vld [vmem:[#allocation24_spill] sm:$0xff] }
 0x206   : > { %v978_v24 = vsub.f32 %v914_v33, %v946_v4  ;;  %v765_v31 = vmul.f32 %v2003_v15, %v2586_v62  ;;  %v2587_v4 = vld [vmem:[#allocation15_spill] sm:$0xff] }
 0x207   : > { %v980_v56 = vsub.f32 %v916_v36, %v948_v32  ;;  %v827_v9 = vpop.permute.xlu0 %826 }
 0x208   : > { %v861_v55 = vpop.permute.xlu1 %860  ;;  %v918_v32 = vadd.f32 %v827_v9, %v1981_v41 }
 0x209   : > { %v2234_v0 = vadd.f32 %v1979_v40, %v861_v55  ;;  %v2584_v40 = vld [vmem:[#allocation6_spill] sm:$0xff] }
 0x20a   : > { %v635_v37 = vmul.f32 %v2583_v38, %v2584_v40 }
 0x20c   : > { %v685_v49 = vsel %vm529_vm0, %v635_v37, 0.0 }
 0x20d   : > { %868 = vrot.lane.b32.xlu0 %v779_v1, %s1587_s26 }
 0x211   : > { %1042 = vrot.lane.b32.xlu0 %v978_v24, %s1588_s29  ;;  %v767_v24 = vmul.f32 %v2013_v3, %v2587_v4 }
 0x215   : > { %1046 = vrot.lane.b32.xlu0 %v980_v56, %s1588_s29 }
 0x222   : > { %686 = vadd.xlane.f32.xlu1 %v685_v49  ;;  %v2588_v49 = vld [vmem:[#allocation19_spill] sm:$0xff] }
 0x233   : > { %834 = vrot.lane.b32.xlu1 %v762_v61, %s1587_s26  ;;  %v766_v61 = vmul.f32 %v2589_v23, %v2588_v49 }
 0x237   : > { %840 = vrot.lane.b32.xlu1 %v765_v31, %s1587_s26 }
 0x238   : > { %v723_v28 = vpop.xlane.xlu0 %722 }
 0x239   : > { %v2256_v25 = vmul.f32 2.0, %v723_v28  ;;  %v2258_v55 = vpop.xlane.xlu1 %674 }
 0x23b   : > { %838 = vrot.lane.b32.xlu1 %v764_v54, %s1587_s26 }
 0x23c   : > { %v672_v33 = vpop.xlane.xlu0 %671 }
 0x23d   : > { %v950_v36 = vmul.f32 2.0, %v672_v33  ;;  %v859_v56 = vpop.permute.xlu1 %858 }
 0x23e   : > { %v2267_v40 = vadd.f32 %v859_v56, %v1983_v42 }
 0x23f   : > { %v982_v2 = vsub.f32 %v918_v32, %v950_v36  ;;  %844 = vrot.lane.b32.xlu1 %v767_v24, %s1587_s26  ;;  %v2591_v32 = vld [vmem:[#allocation7_spill] sm:$0xff] }
 0x240   : > { %v720_v37 = vpop.xlane.xlu0 %719  ;;  %v638_v36 = vmul.f32 %v2588_v49, %v2591_v32 }
 0x241   : > { %v2272_v62 = vmul.f32 2.0, %v720_v37  ;;  %1050 = vrot.lane.b32.xlu0 %v982_v2, %s1588_s29 }
 0x242   : > { %v694_v2 = vsel %vm529_vm0, %v638_v36, 0.0 }
 0x243   : > { %2590 = vst [vmem:[#allocation5_spill] sm:$0xff] %v2272_v62  ;;  %842 = vrot.lane.b32.xlu1 %v766_v61, %s1587_s26  ;;  %v833_v61 = vpop.permute.xlu1 %832 }
 0x244   : > { %v2278_v41 = vpop.xlane.xlu0 %728 }
 0x248   : > { %v678_v42 = vpop.xlane.xlu0 %677 }
 0x249   : > { %v952_v32 = vmul.f32 2.0, %v678_v42 }
 0x24c   : > { %v726_v9 = vpop.xlane.xlu0 %725 }
 0x250   : > { %v735_v28 = vpop.xlane.xlu0 %734 }
 0x251   : > { %v2332_v42 = vmul.f32 2.0, %v735_v28  ;;  %v783_v28 = vmul.f32 %v2015_v47, %v2090_v21  ;;  %v2602_v21 = vsub.f32 %v2167_v11, %v2219_v22 }
 0x254   : > { %v2280_v54 = vpop.xlane.xlu0 %683 }
 0x255   : > { %v954_v11 = vmul.f32 2.0, %v2280_v54 }
 0x258   : > { %v2282_v33 = vpop.xlane.xlu0 %731 }
 0x25c   : > { %v2284_v4 = vpop.xlane.xlu0 %692 }
 0x260   : > { %v2286_v24 = vpop.xlane.xlu0 %740 }
 0x264   : > { %v2290_v56 = vpop.xlane.xlu0 %689 }
 0x267   : > { %695 = vadd.xlane.f32.xlu1 %v694_v2  ;;  %v2307_v2 = vmul.f32 2.0, %v726_v9 }
 0x268   : > { %v2293_v37 = vpop.xlane.xlu0 %737 }
 0x26c   : > { %v2295_v23 = vpop.xlane.xlu0 %698 }
 0x270   : > { %v2297_v31 = vpop.xlane.xlu0 %746 }
 0x271   : > { %2592 = vst [vmem:[#allocation10_spill] sm:$0xff] %v2297_v31  ;;  %v768_v31 = vmul.f32 %v2595_v18, %v2027_v8  ;;  %v2597_v18 = vld [vmem:[#allocation26_spill] sm:$0xff] }
 0x272   : > { %v681_v17 = vpop.xlane.xlu1 %680 }
 0x274   : > { %v2299_v1 = vpop.xlane.xlu0 %743 }
 0x275   : > { %2593 = vst [vmem:[#allocation20_spill] sm:$0xff] %v2299_v1 }
 0x276   : > { %v831_v39 = vpop.permute.xlu1 %830 }
 0x277   : > { %v920_v20 = vadd.f32 %v831_v39, %v1989_v51  ;;  %v2596_v39 = vld [vmem:[#allocation27_spill] sm:$0xff] }
 0x278   : > { %848 = vrot.lane.b32.xlu1 %v769_v29, %s1587_s26  ;;  %v2305_v36 = vpop.xlane.xlu0 %704  ;;  %v777_v29 = vmul.f32 %v1987_v50, %v2596_v39  ;;  %v2599_v39 = vld [vmem:[#allocation30_spill] sm:$0xff] }
 0x279   : > { %v984_v10 = vsub.f32 %v920_v20, %v952_v32 }
 0x27a   : > { %v863_v62 = vpop.permute.xlu1 %862 }
 0x27b   : > { %v2312_v1 = vadd.f32 %v863_v62, %v1991_v52  ;;  %1054 = vrot.lane.b32.xlu0 %v984_v10, %s1588_s29  ;;  %v778_v52 = vmul.f32 %v2597_v18, %v2001_v12  ;;  %v2598_v62 = vld [vmem:[#allocation28_spill] sm:$0xff] }
 0x27c   : > { %846 = vrot.lane.b32.xlu1 %v768_v31, %s1587_s26  ;;  %v2316_v30 = vpop.xlane.xlu0 %701  ;;  %v780_v31 = vmul.f32 %v2598_v62, %v2009_v63  ;;  %v2601_v62 = vsub.f32 %v2098_v34, %v2143_v6 }
 0x280   : > { %864 = vrot.lane.b32.xlu1 %v777_v29, %s1587_s26  ;;  %v2323_v20 = vpop.xlane.xlu0 %752  ;;  %v781_v29 = vmul.f32 %v2005_v16, %v2599_v39  ;;  %v837_v39 = vpop.permute.xlu1 %836 }
 0x281   : > { %v923_v6 = vadd.f32 %v2583_v38, %v837_v39 }
 0x284   : > { %866 = vrot.lane.b32.xlu1 %v778_v52, %s1587_s26  ;;  %v2328_v10 = vpop.xlane.xlu0 %749  ;;  %v2600_v52 = vld [vmem:[#allocation29_spill] sm:$0xff] }
 0x285   : > { %v782_v51 = vmul.f32 %v2600_v52, %v2574_v27 }
 0x288   : > { %870 = vrot.lane.b32.xlu1 %v780_v31, %s1587_s26  ;;  %v869_v9 = vpop.permute.xlu0 %868 }
 0x289   : > { %v2336_v32 = vadd.f32 %v1997_v57, %v869_v9  ;;  %v785_v57 = vmul.f32 %v2579_v14, %v2092_v35  ;;  %v921_v9 = vadd.f32 %v1985_v43, %v833_v61  ;;  %v957_v43 = vmul.f32 2.0, %v2284_v4 }
 0x28b   : > { %v1003_v18 = vsub.f32 %v2336_v32, %v2332_v42  ;;  %v2613_v32 = vld [vmem:[#allocation31_spill] sm:$0xff] }
 0x28c   : > { %872 = vrot.lane.b32.xlu1 %v781_v29, %s1587_s26 }
 0x290   : > { %874 = vrot.lane.b32.xlu1 %v782_v51, %s1587_s26  ;;  %v951_v51 = vmul.f32 2.0, %v2258_v55 }
 0x292   : > { %v983_v31 = vsub.f32 %v2224_v13, %v951_v51 }
 0x294   : > { %876 = vrot.lane.b32.xlu1 %v783_v28, %s1587_s26  ;;  %v956_v28 = vmul.f32 2.0, %v2290_v56 }
 0x298   : > { %878 = vrot.lane.b32.xlu1 %v2086_v58, %s1587_s26  ;;  %v953_v58 = vmul.f32 2.0, %v681_v17 }
 0x29a   : > { %v985_v35 = vsub.f32 %v921_v9, %v953_v58 }
 0x29c   : > { %880 = vrot.lane.b32.xlu1 %v785_v57, %s1587_s26 }
 0x2a0   : > { %1044 = vrot.lane.b32.xlu1 %v2601_v62, %s1588_s29 }
 0x2a4   : > { %1048 = vrot.lane.b32.xlu1 %v2602_v21, %s1588_s29 }
 0x2a8   : > { %1052 = vrot.lane.b32.xlu1 %v983_v31, %s1588_s29 }
 0x2ac   : > { %1056 = vrot.lane.b32.xlu1 %v985_v35, %s1588_s29 }
 0x2af   : > { %v687_v34 = vpop.xlane.xlu1 %686 }
 0x2b0   : > { %v955_v55 = vmul.f32 2.0, %v687_v34  ;;  %v960_v34 = vmul.f32 2.0, %v2316_v30  ;;  %v970_v30 = vmul.f32 2.0, %v2282_v33 }
 0x2b2   : > { %v987_v29 = vsub.f32 %v923_v6, %v955_v55 }
 0x2b3   : > { %v835_v52 = vpop.permute.xlu1 %834 }
 0x2b4   : > { %v922_v22 = vadd.f32 %v835_v52, %v1999_v7  ;;  %1060 = vrot.lane.b32.xlu1 %v987_v29, %s1588_s29  ;;  %v959_v7 = vmul.f32 2.0, %v2295_v23 }
 0x2b6   : > { %v986_v13 = vsub.f32 %v922_v22, %v954_v11  ;;  %v2604_v22 = vsub.f32 %v2173_v60, %v2211_v53  ;;  %v2607_v60 = vsub.f32 %v2229_v26, %v2226_v45  ;;  %v2610_v45 = vsub.f32 %v2312_v1, %v2307_v2  ;;  %v2611_v26 = vld [vmem:[#allocation10_spill] sm:$0xff]  ;;  %v2612_v1 = vld [vmem:[#allocation20_spill] sm:$0xff] }
 0x2b7   : > { %v841_v17 = vpop.permute.xlu1 %840  ;;  %v974_v2 = vmul.f32 2.0, %v2612_v1 }
 0x2b8   : > { %v925_v61 = vadd.f32 %v2003_v15, %v841_v17  ;;  %1058 = vrot.lane.b32.xlu0 %v986_v13, %s1588_s29 }
 0x2ba   : > { %v989_v38 = vsub.f32 %v925_v61, %v957_v43 }
 0x2bb   : > { %v839_v57 = vpop.permute.xlu1 %838 }
 0x2bc   : > { %v924_v62 = vadd.f32 %v839_v57, %v2007_v5  ;;  %1064 = vrot.lane.b32.xlu1 %v989_v38, %s1588_s29  ;;  %v961_v5 = vmul.f32 2.0, %v2305_v36  ;;  %v976_v38 = vmul.f32 2.0, %v2328_v10 }
 0x2be   : > { %v988_v54 = vsub.f32 %v924_v62, %v956_v28 }
 0x2bf   : > { %v845_v51 = vpop.permute.xlu1 %844 }
 0x2c0   : > { %v927_v4 = vadd.f32 %v2013_v3, %v845_v51  ;;  %1062 = vrot.lane.b32.xlu0 %v988_v54, %s1588_s29 }
 0x2c2   : > { %v991_v21 = vsub.f32 %v927_v4, %v959_v7  ;;  %v1043_v7 = vpop.permute.xlu0 %1042 }
 0x2c3   : > { %v843_v15 = vpop.permute.xlu1 %842  ;;  %v1139_v4 = vsel %vm1138_vm1, %v1043_v7, 0.0 }
 0x2c4   : > { %1068 = vrot.lane.b32.xlu1 %v991_v21, %s1588_s29  ;;  %v926_v56 = vadd.f32 %v843_v15, %v2588_v49  ;;  %v969_v49 = vmul.f32 2.0, %v2278_v41  ;;  %v972_v41 = vmul.f32 2.0, %v2293_v37 }
 0x2f4   : > { %v696_v31 = vpop.xlane.xlu1 %695 }
 0x2f5   : > { %v958_v58 = vmul.f32 2.0, %v696_v31 }
 0x2f7   : > { %v990_v9 = vsub.f32 %v926_v56, %v958_v58 }
 0x2f8   : > { %v849_v35 = vpop.permute.xlu1 %848 }
 0x2f9   : > { %v929_v23 = vadd.f32 %v2576_v19, %v849_v35  ;;  %1066 = vrot.lane.b32.xlu0 %v990_v9, %s1588_s29  ;;  %v2603_v19 = vsub.f32 %v2095_v44, %v2131_v59 }
 0x2fb   : > { %v993_v39 = vsub.f32 %v929_v23, %v961_v5 }
 0x2fc   : > { %v847_v3 = vpop.permute.xlu1 %846 }
 0x2fd   : > { %v928_v6 = vadd.f32 %v847_v3, %v2027_v8  ;;  %1072 = vrot.lane.b32.xlu1 %v993_v39, %s1588_s29 }
 0x2ff   : > { %v992_v55 = vsub.f32 %v928_v6, %v960_v34 }
 0x300   : > { %v865_v29 = vpop.permute.xlu1 %864 }
 0x301   : > { %v937_v36 = vadd.f32 %v1987_v50, %v865_v29  ;;  %1076 = vrot.lane.b32.xlu1 %v2603_v19, %s1588_s29  ;;  %1070 = vrot.lane.b32.xlu0 %v992_v55, %s1588_s29  ;;  %v2605_v50 = vsub.f32 %v2159_v48, %v2156_v46  ;;  %v973_v46 = vmul.f32 2.0, %v2286_v24  ;;  %v975_v24 = vmul.f32 2.0, %v2611_v26 }
 0x303   : > { %v1001_v52 = vsub.f32 %v937_v36, %v969_v49 }
 0x304   : > { %v867_v11 = vpop.permute.xlu1 %866 }
 0x305   : > { %v938_v8 = vadd.f32 %v867_v11, %v2001_v12  ;;  %1080 = vrot.lane.b32.xlu1 %v2604_v22, %s1588_s29  ;;  %1074 = vrot.lane.b32.xlu0 %v2605_v50, %s1588_s29  ;;  %v2606_v12 = vsub.f32 %v2234_v0, %v2256_v25 }
 0x307   : > { %v1002_v44 = vsub.f32 %v938_v8, %v970_v30 }
 0x308   : > { %v871_v59 = vpop.permute.xlu1 %870 }
 0x309   : > { %v940_v43 = vadd.f32 %v871_v59, %v2009_v63  ;;  %1084 = vrot.lane.b32.xlu1 %v2606_v12, %s1588_s29  ;;  %1078 = vrot.lane.b32.xlu0 %v2607_v60, %s1588_s29  ;;  %v2608_v63 = vld [vmem:[#allocation5_spill] sm:$0xff] }
 0x30a   : > { %v2609_v37 = vsub.f32 %v2267_v40, %v2608_v63 }
 0x30b   : > { %v1004_v53 = vsub.f32 %v940_v43, %v972_v41 }
 0x30c   : > { %v873_v33 = vpop.permute.xlu1 %872 }
 0x30d   : > { %v941_v48 = vadd.f32 %v2005_v16, %v873_v33  ;;  %1088 = vrot.lane.b32.xlu1 %v1001_v52, %s1588_s29  ;;  %1082 = vrot.lane.b32.xlu0 %v2609_v37, %s1588_s29 }
 0x30f   : > { %v1005_v0 = vsub.f32 %v941_v48, %v973_v46 }
 0x310   : > { %v875_v25 = vpop.permute.xlu1 %874 }
 0x311   : > { %1086 = vrot.lane.b32.xlu0 %v2610_v45, %s1588_s29  ;;  %1092 = vrot.lane.b32.xlu1 %v1003_v18, %s1588_s29  ;;  %v942_v40 = vadd.f32 %v875_v25, %v2574_v27 }
 0x313   : > { %v1006_v42 = vsub.f32 %v942_v40, %v974_v2 }
 0x314   : > { %v877_v16 = vpop.permute.xlu1 %876 }
 0x315   : > { %v943_v13 = vadd.f32 %v2015_v47, %v877_v16  ;;  %1090 = vrot.lane.b32.xlu0 %v1002_v44, %s1588_s29  ;;  %1096 = vrot.lane.b32.xlu1 %v1005_v0, %s1588_s29  ;;  %v977_v47 = vmul.f32 2.0, %v2323_v20  ;;  %v1047_v20 = vpop.permute.xlu0 %1046 }
 0x317   : > { %v1007_v17 = vsub.f32 %v943_v13, %v975_v24 }
 0x318   : > { %v879_v61 = vpop.permute.xlu1 %878 }
 0x319   : > { %1094 = vrot.lane.b32.xlu0 %v1004_v53, %s1588_s29  ;;  %1100 = vrot.lane.b32.xlu1 %v1007_v17, %s1588_s29  ;;  %v944_v18 = vadd.f32 %v879_v61, %v2613_v32  ;;  %v1051_v56 = vpop.permute.xlu0 %1050 }
 0x31a   : > { %v1146_v9 = vsel %vm1138_vm1, %v1051_v56, 0.0 }
 0x31b   : > { %v1008_v27 = vsub.f32 %v944_v18, %v976_v38 }
 0x31c   : > { %v881_v28 = vpop.permute.xlu1 %880 }
 0x31d   : > { %v945_v57 = vadd.f32 %v2579_v14, %v881_v28  ;;  %1098 = vrot.lane.b32.xlu0 %v1006_v42, %s1588_s29  ;;  %v1142_v14 = vsel %vm1138_vm1, %v1047_v20, 0.0  ;;  %v1055_v39 = vpop.permute.xlu0 %1054 }
 0x31e   : > { %v1150_v6 = vsel %vm1138_vm1, %v1055_v39, 0.0 }
 0x31f   : > { %v1009_v62 = vsub.f32 %v945_v57, %v977_v47 }
 0x320   : > { %v1045_v54 = vpop.permute.xlu1 %1044 }
 0x321   : > { %1102 = vrot.lane.b32.xlu0 %v1008_v27, %s1588_s29  ;;  %1104 = vrot.lane.b32.xlu1 %v1009_v62, %s1588_s29  ;;  %v1140_v51 = vsel %vm1138_vm1, %v1045_v54, 0.0 }
 0x322   : > { %v1141_v21 = vadd.f32 %v1140_v51, %v1139_v4 }
 0x324   : > { %v1049_v10 = vpop.permute.xlu1 %1048  ;;  %v1143_v15 = vadd.f32 %v1142_v14, %v1141_v21 }
 0x325   : > { %v1144_v31 = vsel %vm1138_vm1, %v1049_v10, 0.0 }
 0x326   : > { %v1145_v58 = vadd.f32 %v1144_v31, %v1143_v15 }
 0x328   : > { %v1053_v5 = vpop.permute.xlu1 %1052  ;;  %v1147_v35 = vadd.f32 %v1146_v9, %v1145_v58 }
 0x329   : > { %v1148_v23 = vsel %vm1138_vm1, %v1053_v5, 0.0 }
 0x32a   : > { %v1149_v3 = vadd.f32 %v1148_v23, %v1147_v35  ;;  %v1059_v49 = vpop.permute.xlu0 %1058 }
 0x32b   : > { %v1154_v52 = vsel %vm1138_vm1, %v1059_v49, 0.0 }
 0x32c   : > { %v1057_v34 = vpop.permute.xlu1 %1056  ;;  %v1151_v55 = vadd.f32 %v1150_v6, %v1149_v3 }
 0x32d   : > { %v1152_v29 = vsel %vm1138_vm1, %v1057_v34, 0.0 }
 0x32e   : > { %v1153_v36 = vadd.f32 %v1152_v29, %v1151_v55 }
 0x330   : > { %v1061_v19 = vpop.permute.xlu1 %1060  ;;  %v1155_v11 = vadd.f32 %v1154_v52, %v1153_v36 }
 0x331   : > { %v1156_v30 = vsel %vm1138_vm1, %v1061_v19, 0.0 }
 0x332   : > { %v1063_v8 = vpop.permute.xlu0 %1062  ;;  %v1157_v22 = vadd.f32 %v1156_v30, %v1155_v11 }
 0x333   : > { %v1158_v44 = vsel %vm1138_vm1, %v1063_v8, 0.0 }
 0x334   : > { %v1065_v50 = vpop.permute.xlu1 %1064  ;;  %v1159_v59 = vadd.f32 %v1158_v44, %v1157_v22 }
 0x335   : > { %v1160_v41 = vsel %vm1138_vm1, %v1065_v50, 0.0 }
 0x336   : > { %v1161_v53 = vadd.f32 %v1160_v41, %v1159_v59 }
 0x338   : > { %v1069_v43 = vpop.permute.xlu1 %1068 }
 0x339   : > { %v1164_v48 = vsel %vm1138_vm1, %v1069_v43, 0.0 }
 0x36b   : > { %v1067_v12 = vpop.permute.xlu0 %1066 }
 0x36c   : > { %v1162_v60 = vsel %vm1138_vm1, %v1067_v12, 0.0 }
 0x36d   : > { %v1163_v33 = vadd.f32 %v1162_v60, %v1161_v53 }
 0x36f   : > { %v1073_v46 = vpop.permute.xlu1 %1072  ;;  %v1165_v37 = vadd.f32 %v1164_v48, %v1163_v33 }
 0x370   : > { %v1168_v16 = vsel %vm1138_vm1, %v1073_v46, 0.0 }
 0x373   : > { %v1077_v63 = vpop.permute.xlu1 %1076  ;;  %v1071_v0 = vpop.permute.xlu0 %1070 }
 0x374   : > { %v1166_v25 = vsel %vm1138_vm1, %v1071_v0, 0.0  ;;  %v1172_v61 = vsel %vm1138_vm1, %v1077_v63, 0.0 }
 0x375   : > { %v1167_v45 = vadd.f32 %v1166_v25, %v1165_v37 }
 0x377   : > { %v1081_v26 = vpop.permute.xlu1 %1080  ;;  %v1169_v24 = vadd.f32 %v1168_v16, %v1167_v45  ;;  %v1075_v13 = vpop.permute.xlu0 %1074 }
 0x378   : > { %v1170_v40 = vsel %vm1138_vm1, %v1075_v13, 0.0  ;;  %v1176_v28 = vsel %vm1138_vm1, %v1081_v26, 0.0 }
 0x379   : > { %v1171_v17 = vadd.f32 %v1170_v40, %v1169_v24 }
 0x37b   : > { %v1085_v1 = vpop.permute.xlu1 %1084  ;;  %v1173_v2 = vadd.f32 %v1172_v61, %v1171_v17  ;;  %v1079_v42 = vpop.permute.xlu0 %1078 }
 0x37c   : > { %v1174_v32 = vsel %vm1138_vm1, %v1079_v42, 0.0  ;;  %v1180_v7 = vsel %vm1138_vm1, %v1085_v1, 0.0 }
 0x37d   : > { %v1175_v18 = vadd.f32 %v1174_v32, %v1173_v2 }
 0x37f   : > { %v1089_v47 = vpop.permute.xlu1 %1088  ;;  %v1177_v38 = vadd.f32 %v1176_v28, %v1175_v18  ;;  %v1083_v57 = vpop.permute.xlu0 %1082 }
 0x380   : > { %v1178_v27 = vsel %vm1138_vm1, %v1083_v57, 0.0  ;;  %v1184_v10 = vsel %vm1138_vm1, %v1089_v47, 0.0 }
 0x381   : > { %v1179_v62 = vadd.f32 %v1178_v27, %v1177_v38 }
 0x383   : > { %v1093_v54 = vpop.permute.xlu1 %1092  ;;  %v1181_v51 = vadd.f32 %v1180_v7, %v1179_v62  ;;  %v1087_v4 = vpop.permute.xlu0 %1086 }
 0x384   : > { %v1182_v20 = vsel %vm1138_vm1, %v1087_v4, 0.0  ;;  %v1188_v5 = vsel %vm1138_vm1, %v1093_v54, 0.0 }
 0x385   : > { %v1183_v21 = vadd.f32 %v1182_v20, %v1181_v51 }
 0x387   : > { %v1185_v14 = vadd.f32 %v1184_v10, %v1183_v21  ;;  %v1091_v15 = vpop.permute.xlu0 %1090  ;;  %v1097_v56 = vpop.permute.xlu1 %1096 }
 0x388   : > { %v1186_v31 = vsel %vm1138_vm1, %v1091_v15, 0.0  ;;  %v1192_v3 = vsel %vm1138_vm1, %v1097_v56, 0.0 }
 0x389   : > { %v1187_v58 = vadd.f32 %v1186_v31, %v1185_v14 }
 0x38b   : > { %v1189_v9 = vadd.f32 %v1188_v5, %v1187_v58  ;;  %v1095_v35 = vpop.permute.xlu0 %1094  ;;  %v1101_v34 = vpop.permute.xlu1 %1100 }
 0x38c   : > { %v1190_v23 = vsel %vm1138_vm1, %v1095_v35, 0.0  ;;  %v1196_v36 = vsel %vm1138_vm1, %v1101_v34, 0.0 }
 0x38d   : > { %v1191_v39 = vadd.f32 %v1190_v23, %v1189_v9 }
 0x38f   : > { %v1193_v6 = vadd.f32 %v1192_v3, %v1191_v39  ;;  %v1099_v55 = vpop.permute.xlu0 %1098 }
 0x390   : > { %v1194_v29 = vsel %vm1138_vm1, %v1099_v55, 0.0 }
 0x391   : > { %v1195_v49 = vadd.f32 %v1194_v29, %v1193_v6 }
 0x393   : > { %v1105_v19 = vpop.permute.xlu1 %1104  ;;  %v1197_v52 = vadd.f32 %v1196_v36, %v1195_v49  ;;  %v1103_v11 = vpop.permute.xlu0 %1102 }
 0x394   : > { %v1198_v30 = vsel %vm1138_vm1, %v1103_v11, 0.0  ;;  %v1200_v22 = vsel %vm1138_vm1, %v1105_v19, 0.0 }
 0x395   : > { %v1199_v8 = vadd.f32 %v1198_v30, %v1197_v52 }
 0x397   : > { %v1201_v50 = vadd.f32 %v1200_v22, %v1199_v8 }
 0x399   : > { %1202 = vadd.xlane.f32.xlu0 %v1201_v50 }
 0x426   : > { %v1203_v44 = vpop.xlane.xlu0 %1202 }
 0x427   : > { %v1204_v59 = vrot.slane %v1203_v44, 4 }
 0x429   : > { %v1205_v41 = vadd.f32 %v1204_v59, %v1203_v44 }
 0x42b   : > { %v1206_v43 = vrot.slane %v1205_v41, 2 }
 0x42d   : > { %v1207_v12 = vadd.f32 %v1206_v43, %v1205_v41 }
 0x42f   : > { %v1208_v60 = vrot.slane %v1207_v12, 1 }
 0x431   : > { %v1209_v53 = vadd.f32 %v1208_v60, %v1207_v12 }
 0x433   : > { %1480 = vpush %v1209_v53 }
 0x464   : > { %s1481_s7 = spop %1480 }
 0x465   : > { %v1211_v33 = vstv %s1481_s7 }
 0x466   : > { %1212 = vst [vmem:[%s179_s4] sm:$0x1] %v1211_v33 }
 0x467   : > { %1536 = shalt.err (!%p1533_p3)
}
 0x468   : > { %s1537_s24 = scalar_lea.hbm %s2484_s10, 16  ;;  %s1541_s28 = scalar_lea.hbm %s2527_s3, 32 }
 0x469   : > { %p1538_p4 = scmp.ne.s32.totalorder %s2484_s10, %s1537_s24  ;;  %p1542_p9 = scmp.lt.u32.totalorder %s2484_s10, %s2527_s3 }
 0x46a   : > { %p1543_p10 = scmp.lt.u32.totalorder %s1541_s28, %s1537_s24  ;;  %p1545_p12 = scmp.lt.u32.totalorder %s1537_s24, %s2484_s10 }
 0x46b   : > { %p1539_p7 = pnand %p1538_p4, %p1648_p5 }
 0x46c   : > { %p1544_p11 = por %p1543_p10, %p1542_p9 }
 0x46d   : > { %p1540_p8 = pneg %p1539_p7 }
 0x46e   : > { %p1546_p13 = por %p1545_p12, %p1544_p11 }
 0x470   : > { %p1547_p0 = pnand %p1546_p13, %p1540_p8 }
 0x472   : > { %1550 = shalt.err (!%p1547_p0)
}
 0x473   : > { %1482 = dma.vmem_to_hbm [thread:$0]  (%p1648_p5), %s2479_s5, 16, %s2484_s10, %s1214_s11  }
 0x474 PF: > { %p1488_p1 = scmp.ge.s32.totalorder %s1585_s15, 2  ;;  %s1238_s30 = sand.u32 1, %s1573_s12  }
 0x475   : > { %s1239_s4 = scalar_lea.sflag [#allocation3], %s1238_s30 }
 0x476   : > { %p1485_p2 = pnand %p1488_p1, %p1652_p6 }
 0x478   : > { %1568 = dma.done.wait (!%p1485_p2), %s1239_s4, 16  }
 0x479   : > { %1570 = vsyncadd (!%p1485_p2), %s1239_s4, 4294967280  ;;  %p13_p3 = scmp.ge.s32.totalorder %s1635_s18, 4   ;;  %s2614_s12 = smov %s1577_s13 }
 0x47a   : > { %s2615_s13 = smov %s1581_s14  ;;  %s2616_s14 = smov %s1646_s21 }
 0x47b   : > { %s2617_s15 = smov %s1635_s18  ;;  %15 = sbr.rel (!%p13_p3) target bundleno = 3 (0x3), region = 70 }
 0x482   :  { %1243 = vsyncpa [#allocation3], 1 }
 0x483   :  { %1245 = vsyncpa [#allocation3 + $0x1], 1 }

</bundles_post_ra>
